<compile_context>
chip_gen: v7x
topology: tpu7x:2x2x1
jax: 0.10.0
libtpu: 0.0.40
codegen_flags: <defaults>
</compile_context>

<pallas_src>
import jax
import jax.numpy as jnp
from jax.experimental import pallas as pl
from jax.experimental.pallas import tpu as pltpu


# ---------------------------------------------------------------------------
# Kernel bodies.  Empty nn.Sequential => forward is identity.
# ---------------------------------------------------------------------------
def _copy_kernel(x_ref, o_ref):
    # Whole-tile VMEM copy (vreg load + store).
    o_ref[...] = x_ref[...]


def _dma_copy_kernel(x_hbm, o_hbm, sem):
    # Direct HBM -> HBM copy: one DMA, no VMEM staging, no grid.
    cp = pltpu.make_async_copy(x_hbm, o_hbm, sem)
    cp.start()
    cp.wait()


# ---------------------------------------------------------------------------
# Production forward: identity, zero launch cost.
# ---------------------------------------------------------------------------
def keypoint_classifier_forward(x: jax.Array) -> jax.Array:
    """Forward pass of KeyPointClassifier (empty Sequential -> identity)."""
    # TODO(synk): the reference module has no layers and loss_fn is None, so
    # there is no compute to express in a kernel — identity is the whole op.
    return x


# ---------------------------------------------------------------------------
# Explicit Pallas routes (fresh output buffer).
# ---------------------------------------------------------------------------
_SMALL_BYTES = 512 * 1024  # below this, one gridless whole-array VMEM block


def _identity_small_pallas(x: jax.Array) -> jax.Array:
    # Gridless call: no grid loop / index_map; whole array as a single VMEM
    # block.  Explicit VMEM memory spaces; no aliasing (fresh output buffer).
    return pl.pallas_call(
        _copy_kernel,
        out_shape=jax.ShapeDtypeStruct(x.shape, x.dtype),
        in_specs=[pl.BlockSpec(memory_space=pltpu.MemorySpace.VMEM)],
        out_specs=pl.BlockSpec(memory_space=pltpu.MemorySpace.VMEM),
    )(x)


def _identity_dma_pallas(x: jax.Array) -> jax.Array:
    # Large-input route: one HBM->HBM DMA.  Eliminates the
    # HBM->VMEM->vreg->VMEM->HBM double pass entirely.
    return pl.pallas_call(
        _dma_copy_kernel,
        out_shape=jax.ShapeDtypeStruct(x.shape, x.dtype),
        in_specs=[pl.BlockSpec(memory_space=pl.ANY)],
        out_specs=pl.BlockSpec(memory_space=pl.ANY),
        scratch_shapes=[pltpu.SemaphoreType.DMA(())],
    )(x)


def _choose_lanes(total: int) -> int:
    # Largest multiple of 128 that divides `total`, capped at 8192: long
    # contiguous lane-dense rows -> unmasked vst + few DMA descriptors.
    for cand in (8192, 4096, 2048, 1024, 512, 256, 128):
        if total % cand == 0:
            return cand
    return 128


def _identity_tiled_pallas(x: jax.Array, *, tile_bytes: int = 2 * 1024 * 1024) -> jax.Array:
    """VMEM-pipelined tiled copy (alternative to the DMA route).

    Only used when the element count is a multiple of 128 (lane-dense layout);
    otherwise the HBM->HBM DMA path is strictly better, so delegate to it.
    """
    batch, feat = x.shape
    total = batch * feat
    if total % 128 != 0:
        return _identity_dma_pallas(x)

    itemsize = jnp.dtype(x.dtype).itemsize
    lanes = _choose_lanes(total)
    rows = total // lanes
    x2 = x.reshape(rows, lanes)

    # ~2 MiB tiles: <10% per-step overhead (step cost ~0.35 us), and the
    # double-buffered in+out footprint (4 * tile) = 8 MiB stays under v5e's
    # 16 MiB scoped-VMEM default (and far under v6e/v7x limits).
    row_bytes = lanes * itemsize
    tb = max(1, tile_bytes // row_bytes)
    tb = min(tb, rows)
    # Keep >= 2 grid steps when there is enough work, so v7x's 2 TensorCores
    # both get tiles under dimension_semantics=("parallel",).
    if 2 * tb > rows and rows >= 16:
        tb = rows // 2
    if tb < rows:
        tb = max(8, (tb // 8) * 8)  # sublane-aligned partial tiles
        tb = min(tb, rows)
    grid = (pl.cdiv(rows, tb),)

    out2 = pl.pallas_call(
        _copy_kernel,
        out_shape=jax.ShapeDtypeStruct((rows, lanes), x.dtype),
        grid=grid,
        in_specs=[pl.BlockSpec((tb, lanes), lambda i: (i, 0))],
        out_specs=pl.BlockSpec((tb, lanes), lambda i: (i, 0)),
        compiler_params=pltpu.CompilerParams(
            dimension_semantics=("parallel",),
        ),
    )(x2)
    return out2.reshape(batch, feat)


def keypoint_classifier_forward_pallas(x: jax.Array) -> jax.Array:
    """Identity forward that produces a fresh output buffer via Pallas."""
    nbytes = x.size * jnp.dtype(x.dtype).itemsize
    if nbytes <= _SMALL_BYTES:
        return _identity_small_pallas(x)
    return _identity_dma_pallas(x)


if __name__ == "__main__":
    key = jax.random.PRNGKey(0)
    batch, input_size = 2, 63  # module default input_size=63
    x = jax.random.normal(key, (batch, input_size), dtype=jnp.float32)

    # Production path: identity, no kernel launch.
    out_fast = keypoint_classifier_forward(x)

    # Pallas fresh-buffer path (small input -> gridless whole-array VMEM copy).
    out_pallas = jax.block_until_ready(keypoint_classifier_forward_pallas(x))

    # Exercise the HBM->HBM DMA route and the retuned tiled route on a small,
    # lane-aligned tensor (512 x 256 f32 = 512 KiB; tiled path uses an
    # 8192-lane reshape, 8-row tiles, 2 grid steps).
    x_big = jax.random.normal(jax.random.PRNGKey(0), (512, 256), dtype=jnp.float32)
    out_dma = jax.block_until_ready(_identity_dma_pallas(x_big))
    out_tiled = jax.block_until_ready(_identity_tiled_pallas(x_big))

    # Verify identity semantics (forward of empty Sequential returns input).
    assert out_pallas.shape == x.shape and out_pallas.dtype == x.dtype
    assert bool(jnp.array_equal(out_fast, x))
    assert bool(jnp.array_equal(out_pallas, x))
    assert bool(jnp.array_equal(out_dma, x_big))
    assert bool(jnp.array_equal(out_tiled, x_big))

    print("KERNEL_OK")
</pallas_src>

<mosaic_0001>
module attributes {stable_mosaic.version = 11 : i64} {
  func.func @_copy_kernel(%arg0: memref<2x63xf32, #tpu.memory_space<vmem>>, %arg1: memref<2x63xf32, #tpu.memory_space<vmem>>) attributes {dimension_semantics = [], scalar_prefetch = 0 : i64, scratch_operands = 0 : i64, tpu.core_type = #tpu.core_type<tc>} {
    %c0 = arith.constant 0 : index
    %c0_0 = arith.constant 0 : index
    %0 = vector.load %arg0[%c0, %c0_0] : memref<2x63xf32, #tpu.memory_space<vmem>>, vector<2x63xf32>
    %c0_1 = arith.constant 0 : index
    %c0_2 = arith.constant 0 : index
    %1 = vector.load %arg1[%c0_1, %c0_2] : memref<2x63xf32, #tpu.memory_space<vmem>>, vector<2x63xf32>
    tpu.vector_store %arg1[%c0_1, %c0_2], %0 {strides = array<i32>} : memref<2x63xf32, #tpu.memory_space<vmem>>, vector<2x63xf32>,
    return
  }
}

</mosaic_0001>

<bundles_post_ra>
// kernel: tpu_custom_call.1
= control target key start
LH: loop header
LB: loop body
LE: loop exit
PB: predicated region body
PF: predicated region fallthrough
CT: control target
= control target key end

     0   :  { %6 = vsyncpa [#allocation3], 0  ;;  %s125_s0 = inlined_call_operand.hbm [shape: f32[2,63], index: 0, kind: input, shape index: {}]   ;;  %s126_s1 = inlined_call_operand.hbm [shape: f32[2,63], index: 1, kind: output, shape index: {}]  }
   0x1   :  { %7 = vsyncpa [#allocation4], 0  ;;  %s89_s6 = smov [#allocation2]   ;;  %s41_s10 = scalar_lea.hbm %s125_s0, 32 }
   0x2   :  { %s14_s7 = sshll.u32 %s89_s6, 4  ;;  %p42_p0 = scmp.ne.s32.totalorder %s125_s0, %s41_s10  ;;  %s15_s7 = int_to_ptr.vmem [resolvable:$true] %s14_s7 }
   0x3   :  { %p45_p1 = scmp.lt.u32.totalorder %s41_s10, %s125_s0 }
   0x5   :  { %p47_p2 = pnand %p45_p1, %p42_p0 }
   0x7   :  { %50 = shalt.err (!%p47_p2)
}
   0x8   :  { %s51_s15 = scalar_lea.vmem %s15_s7, 32  ;;  %p56_p4 = scmp.lt.s32.totalorder %s15_s7, %s15_s7 }
   0x9   :  { %p52_p3 = scmp.ne.s32.totalorder %s15_s7, %s51_s15  ;;  %p57_p5 = scmp.lt.s32.totalorder %s51_s15, %s51_s15 }
   0xb   :  { %p58_p6 = por %p57_p5, %p56_p4 }
   0xd   :  { %p59_p7 = pnand %p58_p6, %p52_p3 }
   0xf   :  { %62 = shalt.err (!%p59_p7)
}
  0x10   :  { %17 = dma.hbm_to_vmem [thread:$0]  %s125_s0, 32, %s15_s7, [#allocation3]  }
  0x11   :  { %85 = dma.done.wait [#allocation3], 32  }
  0x12   :  { %86 = vsyncadd [#allocation3], 4294967264  ;;  %s90_s18 = smov [#allocation5]   ;;  %vm22_vm0 = vcmask 508928   ;;  %v21_v0 = vld [vmem:[#allocation2] sm:$0x3] }
  0x13   :  { %s30_s19 = sshll.u32 %s90_s18, 4  ;;  %23 = vst.msk [vmem:[#allocation5] sm:$0x3] %vm22_vm0, %v21_v0  ;;  %s31_s19 = int_to_ptr.vmem [resolvable:$true] %s30_s19 }
  0x14   :  { %s63_s20 = scalar_lea.vmem %s31_s19, 32  ;;  %p68_p9 = scmp.lt.s32.totalorder %s31_s19, %s31_s19 }
  0x15   :  { %p64_p8 = scmp.ne.s32.totalorder %s31_s19, %s63_s20  ;;  %p69_p10 = scmp.lt.s32.totalorder %s63_s20, %s63_s20 }
  0x17   :  { %p70_p11 = por %p69_p10, %p68_p9 }
  0x19   :  { %p71_p12 = pnand %p70_p11, %p64_p8 }
  0x1b   :  { %74 = shalt.err (!%p71_p12)
}
  0x1c   :  { %s75_s23 = scalar_lea.hbm %s126_s1, 32 }
  0x1d   :  { %p76_p13 = scmp.ne.s32.totalorder %s126_s1, %s75_s23  ;;  %p79_p0 = scmp.lt.u32.totalorder %s75_s23, %s126_s1 }
  0x1f   :  { %p81_p1 = pnand %p79_p0, %p76_p13 }
  0x21   :  { %84 = shalt.err (!%p81_p1)
}
  0x22   :  { %33 = dma.vmem_to_hbm [thread:$0]  %s31_s19, 32, %s126_s1, [#allocation4]  }
  0x23   :  { %87 = dma.done.wait [#allocation4], 32  }
  0x24   :  { %88 = vsyncadd [#allocation4], 4294967264 }
  0x25   :  { %37 = vsyncpa [#allocation3], 1 }
  0x26   :  { %38 = vsyncpa [#allocation4], 1 }

</bundles_post_ra>
